<compile_context>
chip_gen: v5e
topology: v5e:2x2
jax: 0.10.0
libtpu: 0.0.40
codegen_flags: <defaults>
</compile_context>

<pallas_src>
import jax
import jax.numpy as jnp
from jax.experimental import pallas as pl
from jax.experimental.pallas import tpu as pltpu


def _round_up(n, m):
    return (n + m - 1) // m * m


def _vmem_capacity_bytes():
    """Per-core VMEM capacity; conservative fallback if the query is missing."""
    try:
        return int(pltpu.get_tpu_info().vmem_capacity_bytes)
    except Exception:
        return 64 << 20  # v7x per-TC VMEM (the smallest current generation)


def _call_with_resident_fallback(build_fn):
    """Run build_fn({'pipeline_mode': pl.Buffered(1)}) (single-buffered
    resident operands); fall back to default double-buffering if the installed
    JAX / Mosaic does not support pipeline_mode on pallas_call BlockSpecs."""
    if hasattr(pl, "Buffered"):
        try:
            return build_fn({"pipeline_mode": pl.Buffered(1)})
        except Exception:
            pass
    return build_fn({})


# --------------------------------------------------------------------------
# Kernels
# --------------------------------------------------------------------------
def _ffn_fused_kernel(x_ref, w1t_ref, b1_ref, w2t_ref, b2_ref, o_ref):
    # y1 = x @ W1^T + b1, with W1 pre-transposed -> MXU-native [M,K]x[K,N].
    y1 = jnp.dot(x_ref[...], w1t_ref[...], preferred_element_type=jnp.float32)
    y1 = y1 + b1_ref[...]                       # b1 is [1, hid] f32, broadcasts
    s = jax.nn.sigmoid(y1)                      # f32 (EUP), even for bf16 matmuls
    out = jnp.dot(s.astype(w2t_ref.dtype), w2t_ref[...],
                  preferred_element_type=jnp.float32)
    o_ref[...] = (out + b2_ref[...]).astype(o_ref.dtype)


def _ffn_hidden_tiled_kernel(x_ref, w1t_ref, b1_ref, w2t_ref, b2_ref, o_ref,
                             acc_ref):
    # Hidden (K) tiled variant: grid = (batch_tiles, hidden_tiles), hidden is
    # the trailing "arbitrary" axis; acc_ref is an f32 VMEM accumulator.
    k = pl.program_id(1)

    @pl.when(k == 0)
    def _():
        acc_ref[...] = jnp.zeros_like(acc_ref)

    # Partial first matmul over this hidden chunk; sigmoid is elementwise per
    # hidden unit, so applying it per chunk is exact.
    y1 = jnp.dot(x_ref[...], w1t_ref[...], preferred_element_type=jnp.float32)
    s = jax.nn.sigmoid(y1 + b1_ref[...])
    acc_ref[...] += jnp.dot(s.astype(w2t_ref.dtype), w2t_ref[...],
                            preferred_element_type=jnp.float32)

    @pl.when(k == pl.num_programs(1) - 1)
    def _():
        o_ref[...] = (acc_ref[...] + b2_ref[...]).astype(o_ref.dtype)


# --------------------------------------------------------------------------
# One-time parameter prep (hoisted out of the forward hot path)
# --------------------------------------------------------------------------
def prepare_ffn_params(w1, b1, w2, b2, *, matmul_dtype=None):
    """Pad feature dims to 128-lane multiples, cast matmul operands to
    matmul_dtype (bf16 recommended on v5e/v6e/v7x when tolerance allows) and
    store the weights TRANSPOSED so the kernel RHS is MXU-native. Biases f32.

    w1: [hidden, input] (PyTorch nn.Linear layout), b1: [hidden]
    w2: [output, hidden],                           b2: [output]
    """
    hidden_size, input_size = w1.shape
    output_size, hidden_size2 = w2.shape
    assert hidden_size == hidden_size2

    mm_dtype = (jnp.dtype(matmul_dtype) if matmul_dtype is not None
                else jnp.dtype(w1.dtype))

    in_p = _round_up(input_size, 128)
    hid_p = _round_up(hidden_size, 128)
    out_p = _round_up(output_size, 128)

    w1t = jnp.zeros((in_p, hid_p), mm_dtype).at[:input_size, :hidden_size].set(
        w1.T.astype(mm_dtype))
    w2t = jnp.zeros((hid_p, out_p), mm_dtype).at[:hidden_size, :output_size].set(
        w2.T.astype(mm_dtype))
    b1p = jnp.zeros((1, hid_p), jnp.float32).at[0, :hidden_size].set(
        b1.astype(jnp.float32))
    b2p = jnp.zeros((1, out_p), jnp.float32).at[0, :output_size].set(
        b2.astype(jnp.float32))

    return dict(w1t=w1t, b1=b1p, w2t=w2t, b2=b2p,
                input_size=input_size, hidden_size=hidden_size,
                output_size=output_size, mm_dtype=mm_dtype)


# --------------------------------------------------------------------------
# Forward pass
# --------------------------------------------------------------------------
def feedforward_pallas_prepared(x, params, *, tile_b=128, hidden_block=None):
    """out = sigmoid(x @ W1^T + b1) @ W2^T + b2, fused in one Pallas kernel.

    x: [batch, input_size]; params from prepare_ffn_params().
    Returns [batch, output_size] in x.dtype.
    """
    batch, input_size = x.shape
    assert input_size == params["input_size"]
    w1t, b1p, w2t, b2p = params["w1t"], params["b1"], params["w2t"], params["b2"]
    mm_dtype = params["mm_dtype"]
    output_size = params["output_size"]

    in_p, hid_p = w1t.shape
    out_p = w2t.shape[1]
    out_dtype = jnp.dtype(x.dtype)
    mm_sz = jnp.dtype(mm_dtype).itemsize
    out_sz = out_dtype.itemsize

    # --- batch tiling; ensure >=2 grid steps when possible (v7x megacore) ---
    b8 = _round_up(batch, 8)
    tile_b = _round_up(max(8, min(tile_b, b8)), 8)
    batch_p = _round_up(b8, tile_b)
    if batch_p // tile_b < 2 and batch_p >= 16:
        tile_b = _round_up(batch_p // 2, 8)
        batch_p = _round_up(b8, tile_b)
    n_btiles = batch_p // tile_b

    # --- pad / cast activations (weights were prepped once, outside) ---
    if x.shape == (batch_p, in_p) and x.dtype == mm_dtype:
        x_p = x
    else:
        x_p = jnp.zeros((batch_p, in_p), mm_dtype).at[:batch, :input_size].set(
            x.astype(mm_dtype))

    # --- generation-aware VMEM budget ---
    capacity = _vmem_capacity_bytes()
    budget = int(0.75 * capacity)

    fused_bytes = int(
        (in_p * hid_p + hid_p * out_p) * mm_sz      # resident weights (1x buffered)
        + (hid_p + out_p) * 4                       # resident biases (f32)
        + 2 * tile_b * in_p * mm_sz                 # double-buffered x tiles
        + 2 * tile_b * out_p * out_sz               # double-buffered out tiles
        + tile_b * hid_p * (4 + mm_sz))             # f32 intermediate + cast copy
    fused_need = int(fused_bytes * 1.25) + (1 << 20)

    flops = 2 * batch_p * (in_p * hid_p + hid_p * out_p)
    transcendentals = batch_p * hid_p

    if hidden_block is None and fused_need <= budget:
        # ----------------- Path A: weights fully VMEM-resident ----------------
        vmem_limit = int(min(max(fused_need, 8 << 20), budget))
        bytes_accessed = int(
            x_p.size * mm_sz + (w1t.size + w2t.size) * mm_sz
            + (b1p.size + b2p.size) * 4 + batch_p * out_p * out_sz)

        def run_fused(resident):
            return pl.pallas_call(
                _ffn_fused_kernel,
                out_shape=jax.ShapeDtypeStruct((batch_p, out_p), out_dtype),
                grid=(n_btiles,),
                in_specs=[
                    pl.BlockSpec((tile_b, in_p), lambda i: (i, 0)),
                    pl.BlockSpec((in_p, hid_p), lambda i: (0, 0), **resident),
                    pl.BlockSpec((1, hid_p), lambda i: (0, 0), **resident),
                    pl.BlockSpec((hid_p, out_p), lambda i: (0, 0), **resident),
                    pl.BlockSpec((1, out_p), lambda i: (0, 0), **resident),
                ],
                out_specs=pl.BlockSpec((tile_b, out_p), lambda i: (i, 0)),
                compiler_params=pltpu.CompilerParams(
                    dimension_semantics=("parallel",),
                    vmem_limit_bytes=vmem_limit),
                cost_estimate=pl.CostEstimate(
                    flops=flops, transcendentals=transcendentals,
                    bytes_accessed=bytes_accessed),
            )(x_p, w1t, b1p, w2t, b2p)

        out = _call_with_resident_fallback(run_fused)
    else:
        # -------- Path B: hidden dim tiled as trailing "arbitrary" K axis -----
        def tiled_bytes(th):
            return int(
                2 * tile_b * in_p * mm_sz                 # x tiles
                + 2 * (in_p * th + th * out_p) * mm_sz    # streamed weight slices
                + 2 * th * 4                              # streamed b1 slices
                + out_p * 4                               # resident b2
                + tile_b * out_p * 4                      # f32 accumulator scratch
                + 2 * tile_b * out_p * out_sz             # out tiles
                + tile_b * th * (4 + mm_sz))              # chunk intermediate

        if hidden_block is None:
            th = 128
            cand = 128
            while cand <= hid_p:
                if hid_p % cand == 0 and (int(tiled_bytes(cand) * 1.25)
                                          + (1 << 20)) <= budget:
                    th = cand
                cand += 128
        else:
            th = min(_round_up(max(128, hidden_block), 128), hid_p)
            while hid_p % th != 0:
                th -= 128
        n_ktiles = hid_p // th

        vmem_limit = int(min(max(int(tiled_bytes(th) * 1.25) + (1 << 20),
                                 8 << 20), budget))
        bytes_accessed = int(
            x_p.size * mm_sz
            + n_btiles * (w1t.size + w2t.size) * mm_sz
            + n_btiles * (b1p.size + b2p.size) * 4
            + batch_p * out_p * out_sz)

        def run_tiled(resident):
            return pl.pallas_call(
                _ffn_hidden_tiled_kernel,
                out_shape=jax.ShapeDtypeStruct((batch_p, out_p), out_dtype),
                grid=(n_btiles, n_ktiles),
                in_specs=[
                    pl.BlockSpec((tile_b, in_p), lambda i, k: (i, 0)),   # x resident over k
                    pl.BlockSpec((in_p, th), lambda i, k: (0, k)),       # W1t slice
                    pl.BlockSpec((1, th), lambda i, k: (0, k)),          # b1 slice
                    pl.BlockSpec((th, out_p), lambda i, k: (k, 0)),      # W2t slice
                    pl.BlockSpec((1, out_p), lambda i, k: (0, 0), **resident),
                ],
                out_specs=pl.BlockSpec((tile_b, out_p), lambda i, k: (i, 0)),
                scratch_shapes=[pltpu.VMEM((tile_b, out_p), jnp.float32)],
                compiler_params=pltpu.CompilerParams(
                    dimension_semantics=("parallel", "arbitrary"),
                    vmem_limit_bytes=vmem_limit),
                cost_estimate=pl.CostEstimate(
                    flops=flops, transcendentals=transcendentals,
                    bytes_accessed=bytes_accessed),
            )(x_p, w1t, b1p, w2t, b2p)

        out = _call_with_resident_fallback(run_tiled)

    if out.shape == (batch, output_size):
        return out
    return out[:batch, :output_size]


def feedforward_pallas(x, w1, b1, w2, b2, *, tile_b=128, matmul_dtype=None,
                       hidden_block=None):
    """Convenience wrapper: prep + forward. For real use, call
    prepare_ffn_params once and reuse the result across forward calls."""
    params = prepare_ffn_params(w1, b1, w2, b2, matmul_dtype=matmul_dtype)
    return feedforward_pallas_prepared(x, params, tile_b=tile_b,
                                       hidden_block=hidden_block)


# --------------------------------------------------------------------------
# Self-test
# --------------------------------------------------------------------------
if __name__ == "__main__":
    batch, input_size, hidden_size, output_size = 16, 32, 64, 16

    key = jax.random.PRNGKey(0)
    kx, kw1, kb1, kw2, kb2 = jax.random.split(key, 5)
    x = jax.random.normal(kx, (batch, input_size), dtype=jnp.float32)
    w1 = jax.random.normal(kw1, (hidden_size, input_size), dtype=jnp.float32) * 0.1
    b1 = jax.random.normal(kb1, (hidden_size,), dtype=jnp.float32) * 0.1
    w2 = jax.random.normal(kw2, (output_size, hidden_size), dtype=jnp.float32) * 0.1
    b2 = jax.random.normal(kb2, (output_size,), dtype=jnp.float32) * 0.1

    # Pure-JAX reference (PyTorch FeedForward semantics, f32 end to end).
    ref = jax.nn.sigmoid(x @ w1.T + b1) @ w2.T + b2

    # 1) f32 matmul path, weights prepped once (resident-weight fused kernel).
    params_f32 = prepare_ffn_params(w1, b1, w2, b2)
    out_f32 = jax.block_until_ready(feedforward_pallas_prepared(x, params_f32))
    assert out_f32.shape == (batch, output_size)
    assert jnp.allclose(out_f32, ref, atol=1e-4, rtol=1e-4), "f32 mismatch vs reference"

    # 2) bf16 MXU-input fast path (recommended on v5e/v6e/v7x): looser tolerance.
    params_bf16 = prepare_ffn_params(w1, b1, w2, b2, matmul_dtype=jnp.bfloat16)
    out_bf16 = jax.block_until_ready(feedforward_pallas_prepared(x, params_bf16))
    assert out_bf16.shape == (batch, output_size)
    assert jnp.allclose(out_bf16, ref, atol=3e-2, rtol=3e-2), "bf16 mismatch vs reference"

    # 3) Hidden-dim (K-tiled) fallback path, forced via hidden_block, validating
    #    the accumulator / per-chunk-sigmoid kernel used for large hidden sizes.
    hidden2 = 256
    kw1b, kb1b, kw2b, kb2b = jax.random.split(jax.random.PRNGKey(1), 4)
    w1b = jax.random.normal(kw1b, (hidden2, input_size), dtype=jnp.float32) * 0.1
    b1b = jax.random.normal(kb1b, (hidden2,), dtype=jnp.float32) * 0.1
    w2b = jax.random.normal(kw2b, (output_size, hidden2), dtype=jnp.float32) * 0.1
    b2b = jax.random.normal(kb2b, (output_size,), dtype=jnp.float32) * 0.1
    refb = jax.nn.sigmoid(x @ w1b.T + b1b) @ w2b.T + b2b
    out_tiled = jax.block_until_ready(
        feedforward_pallas(x, w1b, b1b, w2b, b2b, hidden_block=128))
    assert out_tiled.shape == (batch, output_size)
    assert jnp.allclose(out_tiled, refb, atol=1e-4, rtol=1e-4), "K-tiled mismatch"

    print("KERNEL_OK")
</pallas_src>

<mosaic_0001>
module attributes {stable_mosaic.version = 11 : i64} {
  func.func @_ffn_fused_kernel(%arg0: i32, %arg1: memref<8x128xf32, #tpu.memory_space<vmem>>, %arg2: memref<128x128xf32, #tpu.memory_space<vmem>>, %arg3: memref<1x128xf32, #tpu.memory_space<vmem>>, %arg4: memref<128x128xf32, #tpu.memory_space<vmem>>, %arg5: memref<1x128xf32, #tpu.memory_space<vmem>>, %arg6: memref<8x128xf32, #tpu.memory_space<vmem>>) attributes {dimension_semantics = [#tpu.dimension_semantics<parallel>], iteration_bounds = array<i64: 2>, scalar_prefetch = 0 : i64, scratch_operands = 0 : i64, tpu.core_type = #tpu.core_type<tc>, window_params = [{transform_indices = @transform_0, window_bounds = array<i64: 8, 128>}, {pipeline_mode = #tpu.pipeline_mode<synchronous>, transform_indices = @transform_1, window_bounds = array<i64: 128, 128>}, {pipeline_mode = #tpu.pipeline_mode<synchronous>, transform_indices = @transform_2, window_bounds = array<i64: 1, 128>}, {pipeline_mode = #tpu.pipeline_mode<synchronous>, transform_indices = @transform_3, window_bounds = array<i64: 128, 128>}, {pipeline_mode = #tpu.pipeline_mode<synchronous>, transform_indices = @transform_4, window_bounds = array<i64: 1, 128>}, {transform_indices = @transform_5, window_bounds = array<i64: 8, 128>}]} {
    %c0 = arith.constant 0 : index
    %c0_0 = arith.constant 0 : index
    %0 = vector.load %arg1[%c0, %c0_0] : memref<8x128xf32, #tpu.memory_space<vmem>>, vector<8x128xf32>
    %c0_1 = arith.constant 0 : index
    %c0_2 = arith.constant 0 : index
    %1 = vector.load %arg2[%c0_1, %c0_2] : memref<128x128xf32, #tpu.memory_space<vmem>>, vector<128x128xf32>
    %cst = arith.constant dense<0.000000e+00> : vector<8x128xf32>
    %2 = tpu.matmul %0, %1, %cst {dimension_numbers = #tpu.dot_dimension_numbers<[1], [0], [0], [1], [0, 0, 1, 1], [], []>} : vector<8x128xf32>, vector<128x128xf32>, vector<8x128xf32> -> vector<8x128xf32>
    %c0_3 = arith.constant 0 : index
    %c0_4 = arith.constant 0 : index
    %3 = vector.load %arg3[%c0_3, %c0_4] : memref<1x128xf32, #tpu.memory_space<vmem>>, vector<1x128xf32>
    %4 = vector.broadcast %3 : vector<1x128xf32> to vector<8x128xf32>
    %5 = arith.addf %2, %4 : vector<8x128xf32>
    %6 = arith.negf %5 : vector<8x128xf32>
    %7 = math.exp %6 : vector<8x128xf32>
    %cst_5 = arith.constant 1.000000e+00 : f32
    %8 = vector.broadcast %cst_5 : f32 to vector<8x128xf32>
    %9 = arith.addf %8, %7 : vector<8x128xf32>
    %10 = arith.divf %8, %9 : vector<8x128xf32>
    %c0_6 = arith.constant 0 : index
    %c0_7 = arith.constant 0 : index
    %11 = vector.load %arg4[%c0_6, %c0_7] : memref<128x128xf32, #tpu.memory_space<vmem>>, vector<128x128xf32>
    %cst_8 = arith.constant dense<0.000000e+00> : vector<8x128xf32>
    %12 = tpu.matmul %10, %11, %cst_8 {dimension_numbers = #tpu.dot_dimension_numbers<[1], [0], [0], [1], [0, 0, 1, 1], [], []>} : vector<8x128xf32>, vector<128x128xf32>, vector<8x128xf32> -> vector<8x128xf32>
    %c0_9 = arith.constant 0 : index
    %c0_10 = arith.constant 0 : index
    %13 = vector.load %arg5[%c0_9, %c0_10] : memref<1x128xf32, #tpu.memory_space<vmem>>, vector<1x128xf32>
    %14 = vector.broadcast %13 : vector<1x128xf32> to vector<8x128xf32>
    %15 = arith.addf %12, %14 : vector<8x128xf32>
    %c0_11 = arith.constant 0 : index
    %c0_12 = arith.constant 0 : index
    %16 = vector.load %arg6[%c0_11, %c0_12] : memref<8x128xf32, #tpu.memory_space<vmem>>, vector<8x128xf32>
    tpu.vector_store %arg6[%c0_11, %c0_12], %15 {strides = array<i32>} : memref<8x128xf32, #tpu.memory_space<vmem>>, vector<8x128xf32>,
    return
  }
  func.func @transform_0(%arg0: i32) -> (i32, i32) {
    %c0_i32 = arith.constant 0 : i32
    %c0_i32_0 = arith.constant 0 : i32
    return %arg0, %c0_i32 : i32, i32
  }
  func.func @transform_1(%arg0: i32) -> (i32, i32) {
    %c0_i32 = arith.constant 0 : i32
    %c0_i32_0 = arith.constant 0 : i32
    %c0_i32_1 = arith.constant 0 : i32
    return %c0_i32, %c0_i32_0 : i32, i32
  }
  func.func @transform_2(%arg0: i32) -> (i32, i32) {
    %c0_i32 = arith.constant 0 : i32
    %c0_i32_0 = arith.constant 0 : i32
    %c0_i32_1 = arith.constant 0 : i32
    return %c0_i32, %c0_i32_0 : i32, i32
  }
  func.func @transform_3(%arg0: i32) -> (i32, i32) {
    %c0_i32 = arith.constant 0 : i32
    %c0_i32_0 = arith.constant 0 : i32
    %c0_i32_1 = arith.constant 0 : i32
    return %c0_i32, %c0_i32_0 : i32, i32
  }
  func.func @transform_4(%arg0: i32) -> (i32, i32) {
    %c0_i32 = arith.constant 0 : i32
    %c0_i32_0 = arith.constant 0 : i32
    %c0_i32_1 = arith.constant 0 : i32
    return %c0_i32, %c0_i32_0 : i32, i32
  }
  func.func @transform_5(%arg0: i32) -> (i32, i32) {
    %c0_i32 = arith.constant 0 : i32
    %c0_i32_0 = arith.constant 0 : i32
    return %arg0, %c0_i32 : i32, i32
  }
}

module attributes {stable_mosaic.version = 11 : i64} {
  func.func @_ffn_fused_kernel(%arg0: i32, %arg1: memref<8x128xf32, #tpu.memory_space<vmem>>, %arg2: memref<128x128xf32, #tpu.memory_space<vmem>>, %arg3: memref<1x128xf32, #tpu.memory_space<vmem>>, %arg4: memref<128x128xf32, #tpu.memory_space<vmem>>, %arg5: memref<1x128xf32, #tpu.memory_space<vmem>>, %arg6: memref<8x128xf32, #tpu.memory_space<vmem>>) attributes {dimension_semantics = [#tpu.dimension_semantics<parallel>], iteration_bounds = array<i64: 2>, scalar_prefetch = 0 : i64, scratch_operands = 0 : i64, tpu.core_type = #tpu.core_type<tc>, window_params = [{transform_indices = @transform_0, window_bounds = array<i64: 8, 128>}, {pipeline_mode = #tpu.pipeline_mode<synchronous>, transform_indices = @transform_1, window_bounds = array<i64: 128, 128>}, {pipeline_mode = #tpu.pipeline_mode<synchronous>, transform_indices = @transform_2, window_bounds = array<i64: 1, 128>}, {pipeline_mode = #tpu.pipeline_mode<synchronous>, transform_indices = @transform_3, window_bounds = array<i64: 128, 128>}, {pipeline_mode = #tpu.pipeline_mode<synchronous>, transform_indices = @transform_4, window_bounds = array<i64: 1, 128>}, {transform_indices = @transform_5, window_bounds = array<i64: 8, 128>}]} {
    %c0 = arith.constant 0 : index
    %c0_0 = arith.constant 0 : index
    %0 = vector.load %arg1[%c0, %c0_0] : memref<8x128xf32, #tpu.memory_space<vmem>>, vector<8x128xf32>
    %c0_1 = arith.constant 0 : index
    %c0_2 = arith.constant 0 : index
    %1 = vector.load %arg2[%c0_1, %c0_2] : memref<128x128xf32, #tpu.memory_space<vmem>>, vector<128x128xf32>
    %cst = arith.constant dense<0.000000e+00> : vector<8x128xf32>
    %2 = tpu.matmul %0, %1, %cst {dimension_numbers = #tpu.dot_dimension_numbers<[1], [0], [0], [1], [0, 0, 1, 1], [], []>} : vector<8x128xf32>, vector<128x128xf32>, vector<8x128xf32> -> vector<8x128xf32>
    %c0_3 = arith.constant 0 : index
    %c0_4 = arith.constant 0 : index
    %3 = vector.load %arg3[%c0_3, %c0_4] : memref<1x128xf32, #tpu.memory_space<vmem>>, vector<1x128xf32>
    %4 = vector.broadcast %3 : vector<1x128xf32> to vector<8x128xf32>
    %5 = arith.addf %2, %4 : vector<8x128xf32>
    %6 = arith.negf %5 : vector<8x128xf32>
    %7 = math.exp %6 : vector<8x128xf32>
    %cst_5 = arith.constant 1.000000e+00 : f32
    %8 = vector.broadcast %cst_5 : f32 to vector<8x128xf32>
    %9 = arith.addf %8, %7 : vector<8x128xf32>
    %10 = arith.divf %8, %9 : vector<8x128xf32>
    %c0_6 = arith.constant 0 : index
    %c0_7 = arith.constant 0 : index
    %11 = vector.load %arg4[%c0_6, %c0_7] : memref<128x128xf32, #tpu.memory_space<vmem>>, vector<128x128xf32>
    %cst_8 = arith.constant dense<0.000000e+00> : vector<8x128xf32>
    %12 = tpu.matmul %10, %11, %cst_8 {dimension_numbers = #tpu.dot_dimension_numbers<[1], [0], [0], [1], [0, 0, 1, 1], [], []>} : vector<8x128xf32>, vector<128x128xf32>, vector<8x128xf32> -> vector<8x128xf32>
    %c0_9 = arith.constant 0 : index
    %c0_10 = arith.constant 0 : index
    %13 = vector.load %arg5[%c0_9, %c0_10] : memref<1x128xf32, #tpu.memory_space<vmem>>, vector<1x128xf32>
    %14 = vector.broadcast %13 : vector<1x128xf32> to vector<8x128xf32>
    %15 = arith.addf %12, %14 : vector<8x128xf32>
    %c0_11 = arith.constant 0 : index
    %c0_12 = arith.constant 0 : index
    %16 = vector.load %arg6[%c0_11, %c0_12] : memref<8x128xf32, #tpu.memory_space<vmem>>, vector<8x128xf32>
    tpu.vector_store %arg6[%c0_11, %c0_12], %15 {strides = array<i32>} : memref<8x128xf32, #tpu.memory_space<vmem>>, vector<8x128xf32>,
    return
  }
  func.func @transform_0(%arg0: i32) -> (i32, i32) {
    %c0_i32 = arith.constant 0 : i32
    %c0_i32_0 = arith.constant 0 : i32
    return %arg0, %c0_i32 : i32, i32
  }
  func.func @transform_1(%arg0: i32) -> (i32, i32) {
    %c0_i32 = arith.constant 0 : i32
    %c0_i32_0 = arith.constant 0 : i32
    %c0_i32_1 = arith.constant 0 : i32
    return %c0_i32, %c0_i32_0 : i32, i32
  }
  func.func @transform_2(%arg0: i32) -> (i32, i32) {
    %c0_i32 = arith.constant 0 : i32
    %c0_i32_0 = arith.constant 0 : i32
    %c0_i32_1 = arith.constant 0 : i32
    return %c0_i32, %c0_i32_0 : i32, i32
  }
  func.func @transform_3(%arg0: i32) -> (i32, i32) {
    %c0_i32 = arith.constant 0 : i32
    %c0_i32_0 = arith.constant 0 : i32
    %c0_i32_1 = arith.constant 0 : i32
    return %c0_i32, %c0_i32_0 : i32, i32
  }
  func.func @transform_4(%arg0: i32) -> (i32, i32) {
    %c0_i32 = arith.constant 0 : i32
    %c0_i32_0 = arith.constant 0 : i32
    %c0_i32_1 = arith.constant 0 : i32
    return %c0_i32, %c0_i32_0 : i32, i32
  }
  func.func @transform_5(%arg0: i32) -> (i32, i32) {
    %c0_i32 = arith.constant 0 : i32
    %c0_i32_0 = arith.constant 0 : i32
    return %arg0, %c0_i32 : i32, i32
  }
}

</mosaic_0001>

<bundles_post_ra>
// kernel: tpu_custom_call.1
= control target key start
LH: loop header
LB: loop body
LE: loop exit
PB: predicated region body
PF: predicated region fallthrough
CT: control target
= control target key end

     0   :  { %10 = vsyncpa [#allocation3], 0  ;;  %s927_s0 = inlined_call_operand.hbm [shape: f32[16,128], index: 0, kind: input, shape index: {}]   ;;  %s928_s1 = inlined_call_operand.hbm [shape: f32[128,128], index: 1, kind: input, shape index: {}]   ;;  %s929_s2 = inlined_call_operand.vmem [shape: f32[1,128], index: 2, kind: input, shape index: {}]   ;;  %s930_s3 = inlined_call_operand.hbm [shape: f32[128,128], index: 3, kind: input, shape index: {}]   ;;  %s931_s4 = inlined_call_operand.vmem [shape: f32[1,128], index: 4, kind: input, shape index: {}]   ;;  %s932_s5 = inlined_call_operand.hbm [shape: f32[16,128], index: 5, kind: output, shape index: {}]  }
   0x1   :  { %12 = vsyncpa [#allocation3 + $0x1], 0 }
   0x2   :  { %13 = vsyncpa [#allocation6], 0 }
   0x3   :  { %14 = vsyncpa [#allocation4], 0 }
   0x4   :  { %16 = vsyncpa [#allocation4 + $0x1], 0  ;;  %s769_s18 = smov 0   ;;  %s771_s19 = smov 0  }
   0x5   :  { %s773_s20 = smov 0   ;;  %s775_s21 = smov 0  }
   0x6 LB: > { %s174_s24 = sshll.u32 %s928_s1, 4  ;;  %s793_s25 = sadd.s32 4294967295, %s733_s21   ;;  %s733_s21 = sphi %s775_s21, %s943_s21   ;;  %s729_s20 = sphi %s773_s20, %s942_s20   ;;  %s725_s19 = sphi %s771_s19, %s941_s19   ;;  %s721_s18 = sphi %s769_s18, %s940_s18   ;;  %s175_s24 = int_to_ptr.hbm [resolvable:$true] %s174_s24 }
   0x7   : > { %p482_p0 = scmp.ge.s32.totalorder %s733_s21, 1  ;;  %p43_p1 = scmp.eq.s32.totalorder %s793_s25, 0 }
   0x8   : > { %p163_p2 = scmp.lt.s32.totalorder %s733_s21, 3  ;;  %s735_s27 = smov [#allocation5]  }
   0x9   : > { %s176_s28 = sshll.u32 %s735_s27, 4  ;;  %s191_s6 = sshll.u32 %s930_s3, 4  ;;  %s177_s28 = int_to_ptr.vmem [resolvable:$true] %s176_s28  ;;  %s192_s6 = int_to_ptr.hbm [resolvable:$true] %s191_s6 }
   0xa   : > { %p798_p3 = pnand %p482_p0, %p163_p2  ;;  %s736_s7 = smov [#allocation7]  }
   0xb   : > { %s193_s8 = sshll.u32 %s736_s7, 4  ;;  %s737_s9 = smov 128   ;;  %s194_s8 = int_to_ptr.vmem [resolvable:$true] %s193_s8 }
   0xc   : > { %p510_p4 = pneg %p798_p3  ;;  %s738_s10 = smov 8  }
   0xd   : > { %s481_s11 = sadd.s32 4294967294, %s733_s21   ;;  %s812_s12 = sadd.s32 1, %s733_s21  }
   0xe   : > { %p511_p6 = pnand %p510_p4, %p43_p1  ;;  %s26_s13 = ssub.s32 %s733_s21, %s812_s12 }
   0xf   : > { %s29_s14 = sadd.s32 1, %s729_s20  ;;  %p27_p7 = scmp.eq.s32.totalorder %s26_s13, 0 }
  0x10   : > { %513 = dma.hbm_to_vmem [thread:$0]  (!%p511_p6), %s175_s24, 2048, %s177_s28, [#allocation6], %s737_s9, %s737_s9, %s738_s10  }
  0x11   : > { %516 = dma.hbm_to_vmem [thread:$0]  (!%p511_p6), %s192_s6, 2048, %s194_s8, [#allocation6], %s737_s9, %s737_s9, %s738_s10  }
  0x12   : > { %p36_p8 = scmp.ne.s32.totalorder %s729_s20, %s725_s19  ;;  %p37_p9 = scmp.eq.s32.totalorder %s733_s21, 0 }
  0x13   : > { %p42_p10 = scmp.ne.s32.totalorder %s725_s19, %s721_s18  ;;  %p150_p13 = scmp.eq.s32.totalorder %s793_s25, 1 }
  0x14   : > { %s823_s15 = scalar_select %p27_p7, %s729_s20, %s29_s14  }
  0x15   : > { %p825_p11 = por %p37_p9, %p36_p8  ;;  %p831_p12 = por %p43_p1, %p42_p10 }
  0x16   : > { %p156_p0 = scmp.eq.s32.totalorder %s481_s11, 1  ;;  %p527_p2 = scmp.lt.s32.totalorder %s733_s21, 2 }
  0x17   : > { %s210_s22 = sand.u32 1, %s729_s20   ;;  %p838_p4 = por %p150_p13, %p36_p8 }
  0x18   : > { %p842_p6 = por %p156_p0, %p42_p10  ;;  %s486_s27 = sshll.u32 %s210_s22, 3 }
  0x19   : > { %s487_s28 = sshll.u32 %s733_s21, 3  ;;  %s214_s7 = scalar_lea.vmem [#allocation2], %s486_s27 }
  0x1a   : > { %s218_s6 = scalar_lea.hbm %s927_s0, %s487_s28  ;;  %s222_s8 = sshll.u32 %s214_s7, 4  ;;  %s223_s8 = int_to_ptr.vmem [resolvable:$true] %s222_s8 }
  0x1b   : > { %s220_s9 = sshll.u32 %s218_s6, 4  ;;  %p852_p7 = pnand %p527_p2, %p825_p11  ;;  %s221_s9 = int_to_ptr.hbm [resolvable:$true] %s220_s9 }
  0x1c   : > { %s211_s11 = scalar_lea.sflag [#allocation3], %s210_s22  ;;  %s633_s13 = sshra.s32 %s221_s9, 4  ;;  %s634_s13 = int_to_ptr.hbm [resolvable:$true] %s633_s13 }
  0x1d   : > { %s635_s14 = scalar_lea.hbm %s634_s13, 8  ;;  %p637_p9 = pneg %p852_p7 }
  0x1e   : > { %p636_p8 = scmp.ne.s32.totalorder %s634_s13, %s635_s14  ;;  %s640_s29 = scalar_lea.hbm %s927_s0, 16 }
  0x1f   : > { %p641_p11 = scmp.lt.s32.totalorder %s634_s13, %s927_s0  ;;  %p642_p0 = scmp.lt.s32.totalorder %s640_s29, %s635_s14 }
  0x20   : > { %p638_p10 = pnand %p637_p9, %p636_p8 }
  0x21   : > { %p643_p2 = por %p642_p0, %p641_p11 }
  0x22   : > { %p639_p13 = pneg %p638_p10 }
  0x24   : > { %p644_p5 = pnand %p643_p2, %p639_p13 }
  0x26   : > { %647 = shalt.err (!%p644_p5)
}
  0x27   : > { %520 = dma.hbm_to_vmem [thread:$0]  (!%p852_p7), %s221_s9, 128, %s223_s8, %s211_s11  }
  0x28   : > { %231 = sbr.rel (%p798_p3) target bundleno = 367 (0x16f), region = 40  ;;  %s869_s22 = sand.u32 (!%p798_p3), 1, %s725_s19  }
  0x29   : > { %s489_s6 = sshll.u32 (!%p798_p3), %s869_s22, 3  ;;  %s234_s7 = scalar_lea.sflag (!%p798_p3), [#allocation3], %s869_s22 }
  0x2a   : > { %s875_s13 = scalar_lea.vmem (!%p798_p3), [#allocation2], %s489_s6 }
  0x2d   : > { %708 = dma.done.wait (%p831_p12), %s234_s7, 128  }
  0x2e   : > { %710 = vsyncadd (%p831_p12), %s234_s7, 4294967168 }
  0x2f   : > { %712 = dma.done.wait (%p43_p1), [#allocation6], 4096  }
  0x30   : > { %714 = vsyncadd (%p43_p1), [#allocation6], 4294963200  ;;  %v291_v0 = vld [vmem:[#allocation5 + $0x78] sm:$0xff]  ;;  %v290_v1 = vld [vmem:[#allocation5 + $0x70] sm:$0xff]  ;;  %s495_s8 = sshll.u32 %s793_s25, 3  ;;  %s274_s28 = scalar_lea.vmem [#allocation8], %s489_s6 }
  0x31   : > { %296 = vmatpush.msra.mxu0 %v291_v0  ;;  %v289_v2 = vld [vmem:[#allocation5 + $0x68] sm:$0xff]  ;;  %v288_v3 = vld [vmem:[#allocation5 + $0x60] sm:$0xff]  ;;  %v287_v4 = vld [vmem:[#allocation5 + $0x58] sm:$0xff]  ;;  %s387_s11 = scalar_lea.hbm %s932_s5, %s495_s8  ;;  %s389_s29 = sshll.u32 %s274_s28, 4  ;;  %s390_s29 = int_to_ptr.vmem [resolvable:$true] %s389_s29 }
  0x32   : > { %v286_v5 = vld [vmem:[#allocation5 + $0x50] sm:$0xff]  ;;  %v285_v6 = vld [vmem:[#allocation5 + $0x48] sm:$0xff]  ;;  %v284_v7 = vld [vmem:[#allocation5 + $0x40] sm:$0xff]  ;;  %s391_s30 = sshll.u32 %s387_s11, 4  ;;  %s377_s16 = scalar_lea.sflag [#allocation4], %s869_s22  ;;  %s392_s30 = int_to_ptr.hbm [resolvable:$true] %s391_s30 }
  0x33   : > { %297 = vmatpush.msra.mxu0 %v290_v1  ;;  %v283_v8 = vld [vmem:[#allocation5 + $0x38] sm:$0xff]  ;;  %v282_v9 = vld [vmem:[#allocation5 + $0x30] sm:$0xff]  ;;  %v281_v10 = vld [vmem:[#allocation5 + $0x28] sm:$0xff]  ;;  %s677_s25 = sshra.s32 %s392_s30, 4  ;;  %s683_s17 = scalar_lea.hbm %s932_s5, 16  ;;  %s678_s25 = int_to_ptr.hbm [resolvable:$true] %s677_s25 }
  0x34   : > { %v280_v11 = vld [vmem:[#allocation5 + $0x20] sm:$0xff]  ;;  %v279_v12 = vld [vmem:[#allocation5 + $0x18] sm:$0xff]  ;;  %v278_v13 = vld [vmem:[#allocation5 + $0x10] sm:$0xff]  ;;  %s679_s7 = scalar_lea.hbm %s678_s25, 8  ;;  %p684_p12 = scmp.lt.s32.totalorder %s678_s25, %s932_s5 }
  0x35   : > { %298 = vmatpush.msra.mxu0 %v289_v2  ;;  %v277_v14 = vld [vmem:[#allocation5 + $0x8] sm:$0xff]  ;;  %v276_v15 = vld [vmem:[#allocation5] sm:$0xff]  ;;  %v275_v16 = vld [vmem:[%s875_s13] sm:$0xff]  ;;  %p680_p1 = scmp.ne.s32.totalorder %s678_s25, %s679_s7  ;;  %p685_p7 = scmp.lt.s32.totalorder %s683_s17, %s679_s7 }
  0x36   : > { %v350_v17 = vld [vmem:[#allocation7 + $0x78] sm:$0xff]  ;;  %v349_v18 = vld [vmem:[#allocation7 + $0x70] sm:$0xff]  ;;  %v348_v19 = vld [vmem:[#allocation7 + $0x68] sm:$0xff] }
  0x37   : > { %299 = vmatpush.msra.mxu0 %v288_v3  ;;  %355 = vmatpush.msra.mxu1 %v350_v17  ;;  %v347_v20 = vld [vmem:[#allocation7 + $0x60] sm:$0xff]  ;;  %v346_v21 = vld [vmem:[#allocation7 + $0x58] sm:$0xff]  ;;  %v345_v22 = vld [vmem:[#allocation7 + $0x50] sm:$0xff]  ;;  %p681_p3 = pnand %p680_p1, %p838_p4  ;;  %p686_p8 = por %p685_p7, %p684_p12 }
  0x38   : > { %v344_v23 = vld [vmem:[#allocation7 + $0x48] sm:$0xff]  ;;  %v343_v24 = vld [vmem:[#allocation7 + $0x40] sm:$0xff]  ;;  %v342_v25 = vld [vmem:[#allocation7 + $0x38] sm:$0xff] }
  0x39   : > { %300 = vmatpush.msra.mxu0 %v287_v4  ;;  %356 = vmatpush.msra.mxu1 %v349_v18  ;;  %v341_v26 = vld [vmem:[#allocation7 + $0x30] sm:$0xff]  ;;  %v340_v27 = vld [vmem:[#allocation7 + $0x28] sm:$0xff]  ;;  %v339_v28 = vld [vmem:[#allocation7 + $0x20] sm:$0xff]  ;;  %p682_p5 = pneg %p681_p3 }
  0x3a   : > { %v338_v29 = vld [vmem:[#allocation7 + $0x18] sm:$0xff]  ;;  %v337_v30 = vld [vmem:[#allocation7 + $0x10] sm:$0xff]  ;;  %v336_v31 = vld [vmem:[#allocation7 + $0x8] sm:$0xff] }
  0x3b   : > { %301 = vmatpush.msra.mxu0 %v286_v5  ;;  %357 = vmatpush.msra.mxu1 %v348_v19  ;;  %v335_v32 = vld [vmem:[#allocation7] sm:$0xff]  ;;  %v567_v33 = vld [vmem:[%s929_s2] ss:$0 sm:$0xff]  ;;  %p687_p9 = pnand %p686_p8, %p682_p5 }
  0x3c   : > { %v568_v49 = vld [vmem:[%s931_s4] ss:$0 sm:$0xff] }
  0x3d   : > { %302 = vmatpush.msra.mxu0 %v285_v6  ;;  %358 = vmatpush.msra.mxu1 %v347_v20 }
  0x3f   : > { %303 = vmatpush.msra.mxu0 %v284_v7  ;;  %359 = vmatpush.msra.mxu1 %v346_v21 }
  0x41   : > { %304 = vmatpush.msra.mxu0 %v283_v8  ;;  %360 = vmatpush.msra.mxu1 %v345_v22 }
  0x43   : > { %305 = vmatpush.msra.mxu0 %v282_v9  ;;  %361 = vmatpush.msra.mxu1 %v344_v23 }
  0x45   : > { %306 = vmatpush.msra.mxu0 %v281_v10  ;;  %362 = vmatpush.msra.mxu1 %v343_v24 }
  0x47   : > { %307 = vmatpush.msra.mxu0 %v280_v11  ;;  %363 = vmatpush.msra.mxu1 %v342_v25 }
  0x49   : > { %308 = vmatpush.msra.mxu0 %v279_v12  ;;  %364 = vmatpush.msra.mxu1 %v341_v26 }
  0x4b   : > { %309 = vmatpush.msra.mxu0 %v278_v13  ;;  %365 = vmatpush.msra.mxu1 %v340_v27 }
  0x4d   : > { %310 = vmatpush.msra.mxu0 %v277_v14  ;;  %366 = vmatpush.msra.mxu1 %v339_v28 }
  0x4f   : > { %311 = vmatpush.msra.mxu0 %v276_v15  ;;  %367 = vmatpush.msra.mxu1 %v338_v29 }
  0x50   : > { %312 = vmatmul.f32.vlgmr.msra.gmra.mxu0 %v275_v16 }
  0x51   : > { %368 = vmatpush.msra.mxu1 %v337_v30 }
  0x53   : > { %369 = vmatpush.msra.mxu1 %v336_v31 }
  0x55   : > { %370 = vmatpush.msra.mxu1 %v335_v32 }
  0xcd   : > { %v313_v34 = vpop.f32.mrf.mxu0 }
  0xce   : > { %v314_v35 = vadd.f32 %v567_v33, %v313_v34 }
  0xd0   : > { %v493_v36 = vmul.f32 -1.442695, %v314_v35 }
  0xd2   : > { %569 = vpow2.f32 %v493_v36 }
  0xd8   : > { %v570_v37 = vpop.eup %569 }
  0xd9   : > { %v319_v38 = vadd.f32 1.0, %v570_v37 }
  0xdb   : > { %571 = vrcp.f32 %v319_v38  ;;  %v331_v42 = vand.u32 2147483648, %v319_v38  ;;  %v329_v44 = vand.u32 2147483647, %v319_v38  ;;  %vm325_vm1 = vweird.f32 %v319_v38 }
  0xdd   : > { %v332_v46 = vor.u32 1.1754944e-38, %v331_v42  ;;  %vm330_vm3 = vcmp.eq.f32.partialorder %v329_v44, 8.507059e+37 }
  0xe1   : > { %v572_v39 = vpop.eup %571 }
  0xe2   : > { %v321_v40 = vmul.f32 %v572_v39, %v319_v38  ;;  %vm326_vm0 = vweird.f32 %v572_v39 }
  0xe3   : > { %vm327_vm2 = vmor %vm325_vm1, %vm326_vm0 }
  0xe4   : > { %v322_v41 = vsub.f32 1.0, %v321_v40 }
  0xe6   : > { %v323_v43 = vmul.f32 %v572_v39, %v322_v41 }
  0xe8   : > { %v324_v45 = vadd.f32 %v572_v39, %v323_v43 }
  0xea   : > { %v328_v47 = vsel %vm327_vm2, %v572_v39, %v324_v45 }
  0xeb   : > { %v333_v48 = vsel %vm330_vm3, %v332_v46, %v328_v47 }
  0xec   : > { %371 = vmatmul.f32.vlgmr.msra.gmra.mxu1 %v333_v48 }
 0x169   : > { %v372_v50 = vpop.f32.mrf.mxu1 }
 0x16a   : > { %v373_v51 = vadd.f32 %v568_v49, %v372_v50 }
 0x16c   : > { %375 = vst [vmem:[%s274_s28] sm:$0xff] %v373_v51 }
 0x16d   : > { %690 = shalt.err (!%p687_p9)
}
 0x16e   : > { %508 = dma.vmem_to_hbm [thread:$0]  (%p838_p4), %s390_s29, 128, %s392_s30, %s377_s16  }
 0x16f PF: > { %s403_s22 = sand.u32 1, %s721_s18   ;;  %p939_p10 = scmp.ge.s32.totalorder %s733_s21, 2 }
 0x170   : > { %s404_s9 = scalar_lea.sflag [#allocation4], %s403_s22 }
 0x171   : > { %p522_p13 = pnand %p939_p10, %p842_p6 }
 0x173   : > { %p523_p11 = pneg %p522_p13 }
 0x175   : > { %716 = dma.done.wait (%p523_p11), %s404_s9, 128  }
 0x176   : > { %718 = vsyncadd (%p523_p11), %s404_s9, 4294967168  ;;  %p19_p0 = scmp.ge.s32.totalorder %s812_s12, 4   ;;  %s940_s18 = smov %s725_s19 }
 0x177   : > { %s941_s19 = smov %s729_s20  ;;  %s942_s20 = smov %s823_s15 }
 0x178   : > { %s943_s21 = smov %s812_s12  ;;  %21 = sbr.rel (!%p19_p0) target bundleno = 6 (0x6), region = 93 }
 0x17d   :  { %410 = vsyncpa [#allocation3], 1 }
 0x17e   :  { %412 = vsyncpa [#allocation3 + $0x1], 1 }
 0x17f   :  { %413 = vsyncpa [#allocation6], 1 }
 0x180   :  { %414 = vsyncpa [#allocation4], 1 }
 0x181   :  { %416 = vsyncpa [#allocation4 + $0x1], 1 }

// kernel: tpu_custom_call.1
= control target key start
LH: loop header
LB: loop body
LE: loop exit
PB: predicated region body
PF: predicated region fallthrough
CT: control target
= control target key end

     0   :  { %10 = vsyncpa [#allocation3], 0  ;;  %s927_s0 = inlined_call_operand.hbm [shape: f32[16,128], index: 0, kind: input, shape index: {}]   ;;  %s928_s1 = inlined_call_operand.hbm [shape: f32[128,128], index: 1, kind: input, shape index: {}]   ;;  %s929_s2 = inlined_call_operand.vmem [shape: f32[1,128], index: 2, kind: input, shape index: {}]   ;;  %s930_s3 = inlined_call_operand.hbm [shape: f32[128,128], index: 3, kind: input, shape index: {}]   ;;  %s931_s4 = inlined_call_operand.vmem [shape: f32[1,128], index: 4, kind: input, shape index: {}]   ;;  %s932_s5 = inlined_call_operand.hbm [shape: f32[16,128], index: 5, kind: output, shape index: {}]  }
   0x1   :  { %12 = vsyncpa [#allocation3 + $0x1], 0 }
   0x2   :  { %13 = vsyncpa [#allocation6], 0 }
   0x3   :  { %14 = vsyncpa [#allocation4], 0 }
   0x4   :  { %16 = vsyncpa [#allocation4 + $0x1], 0  ;;  %s769_s18 = smov 0   ;;  %s771_s19 = smov 0  }
   0x5   :  { %s773_s20 = smov 0   ;;  %s775_s21 = smov 0  }
   0x6 LB: > { %s174_s24 = sshll.u32 %s928_s1, 4  ;;  %s793_s25 = sadd.s32 4294967295, %s733_s21   ;;  %s733_s21 = sphi %s775_s21, %s943_s21   ;;  %s729_s20 = sphi %s773_s20, %s942_s20   ;;  %s725_s19 = sphi %s771_s19, %s941_s19   ;;  %s721_s18 = sphi %s769_s18, %s940_s18   ;;  %s175_s24 = int_to_ptr.hbm [resolvable:$true] %s174_s24 }
   0x7   : > { %p482_p0 = scmp.ge.s32.totalorder %s733_s21, 1  ;;  %p43_p1 = scmp.eq.s32.totalorder %s793_s25, 0 }
   0x8   : > { %p163_p2 = scmp.lt.s32.totalorder %s733_s21, 3  ;;  %s735_s27 = smov [#allocation5]  }
   0x9   : > { %s176_s28 = sshll.u32 %s735_s27, 4  ;;  %s191_s6 = sshll.u32 %s930_s3, 4  ;;  %s177_s28 = int_to_ptr.vmem [resolvable:$true] %s176_s28  ;;  %s192_s6 = int_to_ptr.hbm [resolvable:$true] %s191_s6 }
   0xa   : > { %p798_p3 = pnand %p482_p0, %p163_p2  ;;  %s736_s7 = smov [#allocation7]  }
   0xb   : > { %s193_s8 = sshll.u32 %s736_s7, 4  ;;  %s737_s9 = smov 128   ;;  %s194_s8 = int_to_ptr.vmem [resolvable:$true] %s193_s8 }
   0xc   : > { %p510_p4 = pneg %p798_p3  ;;  %s738_s10 = smov 8  }
   0xd   : > { %s481_s11 = sadd.s32 4294967294, %s733_s21   ;;  %s812_s12 = sadd.s32 1, %s733_s21  }
   0xe   : > { %p511_p6 = pnand %p510_p4, %p43_p1  ;;  %s26_s13 = ssub.s32 %s733_s21, %s812_s12 }
   0xf   : > { %s29_s14 = sadd.s32 1, %s729_s20  ;;  %p27_p7 = scmp.eq.s32.totalorder %s26_s13, 0 }
  0x10   : > { %513 = dma.hbm_to_vmem [thread:$0]  (!%p511_p6), %s175_s24, 2048, %s177_s28, [#allocation6], %s737_s9, %s737_s9, %s738_s10  }
  0x11   : > { %516 = dma.hbm_to_vmem [thread:$0]  (!%p511_p6), %s192_s6, 2048, %s194_s8, [#allocation6], %s737_s9, %s737_s9, %s738_s10  }
  0x12   : > { %p36_p8 = scmp.ne.s32.totalorder %s729_s20, %s725_s19  ;;  %p37_p9 = scmp.eq.s32.totalorder %s733_s21, 0 }
  0x13   : > { %p42_p10 = scmp.ne.s32.totalorder %s725_s19, %s721_s18  ;;  %p150_p13 = scmp.eq.s32.totalorder %s793_s25, 1 }
  0x14   : > { %s823_s15 = scalar_select %p27_p7, %s729_s20, %s29_s14  }
  0x15   : > { %p825_p11 = por %p37_p9, %p36_p8  ;;  %p831_p12 = por %p43_p1, %p42_p10 }
  0x16   : > { %p156_p0 = scmp.eq.s32.totalorder %s481_s11, 1  ;;  %p527_p2 = scmp.lt.s32.totalorder %s733_s21, 2 }
  0x17   : > { %s210_s22 = sand.u32 1, %s729_s20   ;;  %p838_p4 = por %p150_p13, %p36_p8 }
  0x18   : > { %p842_p6 = por %p156_p0, %p42_p10  ;;  %s486_s27 = sshll.u32 %s210_s22, 3 }
  0x19   : > { %s487_s28 = sshll.u32 %s733_s21, 3  ;;  %s214_s7 = scalar_lea.vmem [#allocation2], %s486_s27 }
  0x1a   : > { %s218_s6 = scalar_lea.hbm %s927_s0, %s487_s28  ;;  %s222_s8 = sshll.u32 %s214_s7, 4  ;;  %s223_s8 = int_to_ptr.vmem [resolvable:$true] %s222_s8 }
  0x1b   : > { %s220_s9 = sshll.u32 %s218_s6, 4  ;;  %p852_p7 = pnand %p527_p2, %p825_p11  ;;  %s221_s9 = int_to_ptr.hbm [resolvable:$true] %s220_s9 }
  0x1c   : > { %s211_s11 = scalar_lea.sflag [#allocation3], %s210_s22  ;;  %s633_s13 = sshra.s32 %s221_s9, 4  ;;  %s634_s13 = int_to_ptr.hbm [resolvable:$true] %s633_s13 }
  0x1d   : > { %s635_s14 = scalar_lea.hbm %s634_s13, 8  ;;  %p637_p9 = pneg %p852_p7 }
  0x1e   : > { %p636_p8 = scmp.ne.s32.totalorder %s634_s13, %s635_s14  ;;  %s640_s29 = scalar_lea.hbm %s927_s0, 16 }
  0x1f   : > { %p641_p11 = scmp.lt.s32.totalorder %s634_s13, %s927_s0  ;;  %p642_p0 = scmp.lt.s32.totalorder %s640_s29, %s635_s14 }
  0x20   : > { %p638_p10 = pnand %p637_p9, %p636_p8 }
  0x21   : > { %p643_p2 = por %p642_p0, %p641_p11 }
  0x22   : > { %p639_p13 = pneg %p638_p10 }
  0x24   : > { %p644_p5 = pnand %p643_p2, %p639_p13 }
  0x26   : > { %647 = shalt.err (!%p644_p5)
}
  0x27   : > { %520 = dma.hbm_to_vmem [thread:$0]  (!%p852_p7), %s221_s9, 128, %s223_s8, %s211_s11  }
  0x28   : > { %231 = sbr.rel (%p798_p3) target bundleno = 367 (0x16f), region = 40  ;;  %s869_s22 = sand.u32 (!%p798_p3), 1, %s725_s19  }
  0x29   : > { %s489_s6 = sshll.u32 (!%p798_p3), %s869_s22, 3  ;;  %s234_s7 = scalar_lea.sflag (!%p798_p3), [#allocation3], %s869_s22 }
  0x2a   : > { %s875_s13 = scalar_lea.vmem (!%p798_p3), [#allocation2], %s489_s6 }
  0x2d   : > { %708 = dma.done.wait (%p831_p12), %s234_s7, 128  }
  0x2e   : > { %710 = vsyncadd (%p831_p12), %s234_s7, 4294967168 }
  0x2f   : > { %712 = dma.done.wait (%p43_p1), [#allocation6], 4096  }
  0x30   : > { %714 = vsyncadd (%p43_p1), [#allocation6], 4294963200  ;;  %v291_v0 = vld [vmem:[#allocation5 + $0x78] sm:$0xff]  ;;  %v290_v1 = vld [vmem:[#allocation5 + $0x70] sm:$0xff]  ;;  %s495_s8 = sshll.u32 %s793_s25, 3  ;;  %s274_s28 = scalar_lea.vmem [#allocation8], %s489_s6 }
  0x31   : > { %296 = vmatpush.msra.mxu0 %v291_v0  ;;  %v289_v2 = vld [vmem:[#allocation5 + $0x68] sm:$0xff]  ;;  %v288_v3 = vld [vmem:[#allocation5 + $0x60] sm:$0xff]  ;;  %v287_v4 = vld [vmem:[#allocation5 + $0x58] sm:$0xff]  ;;  %s387_s11 = scalar_lea.hbm %s932_s5, %s495_s8  ;;  %s389_s29 = sshll.u32 %s274_s28, 4  ;;  %s390_s29 = int_to_ptr.vmem [resolvable:$true] %s389_s29 }
  0x32   : > { %v286_v5 = vld [vmem:[#allocation5 + $0x50] sm:$0xff]  ;;  %v285_v6 = vld [vmem:[#allocation5 + $0x48] sm:$0xff]  ;;  %v284_v7 = vld [vmem:[#allocation5 + $0x40] sm:$0xff]  ;;  %s391_s30 = sshll.u32 %s387_s11, 4  ;;  %s377_s16 = scalar_lea.sflag [#allocation4], %s869_s22  ;;  %s392_s30 = int_to_ptr.hbm [resolvable:$true] %s391_s30 }
  0x33   : > { %297 = vmatpush.msra.mxu0 %v290_v1  ;;  %v283_v8 = vld [vmem:[#allocation5 + $0x38] sm:$0xff]  ;;  %v282_v9 = vld [vmem:[#allocation5 + $0x30] sm:$0xff]  ;;  %v281_v10 = vld [vmem:[#allocation5 + $0x28] sm:$0xff]  ;;  %s677_s25 = sshra.s32 %s392_s30, 4  ;;  %s683_s17 = scalar_lea.hbm %s932_s5, 16  ;;  %s678_s25 = int_to_ptr.hbm [resolvable:$true] %s677_s25 }
  0x34   : > { %v280_v11 = vld [vmem:[#allocation5 + $0x20] sm:$0xff]  ;;  %v279_v12 = vld [vmem:[#allocation5 + $0x18] sm:$0xff]  ;;  %v278_v13 = vld [vmem:[#allocation5 + $0x10] sm:$0xff]  ;;  %s679_s7 = scalar_lea.hbm %s678_s25, 8  ;;  %p684_p12 = scmp.lt.s32.totalorder %s678_s25, %s932_s5 }
  0x35   : > { %298 = vmatpush.msra.mxu0 %v289_v2  ;;  %v277_v14 = vld [vmem:[#allocation5 + $0x8] sm:$0xff]  ;;  %v276_v15 = vld [vmem:[#allocation5] sm:$0xff]  ;;  %v275_v16 = vld [vmem:[%s875_s13] sm:$0xff]  ;;  %p680_p1 = scmp.ne.s32.totalorder %s678_s25, %s679_s7  ;;  %p685_p7 = scmp.lt.s32.totalorder %s683_s17, %s679_s7 }
  0x36   : > { %v350_v17 = vld [vmem:[#allocation7 + $0x78] sm:$0xff]  ;;  %v349_v18 = vld [vmem:[#allocation7 + $0x70] sm:$0xff]  ;;  %v348_v19 = vld [vmem:[#allocation7 + $0x68] sm:$0xff] }
  0x37   : > { %299 = vmatpush.msra.mxu0 %v288_v3  ;;  %355 = vmatpush.msra.mxu1 %v350_v17  ;;  %v347_v20 = vld [vmem:[#allocation7 + $0x60] sm:$0xff]  ;;  %v346_v21 = vld [vmem:[#allocation7 + $0x58] sm:$0xff]  ;;  %v345_v22 = vld [vmem:[#allocation7 + $0x50] sm:$0xff]  ;;  %p681_p3 = pnand %p680_p1, %p838_p4  ;;  %p686_p8 = por %p685_p7, %p684_p12 }
  0x38   : > { %v344_v23 = vld [vmem:[#allocation7 + $0x48] sm:$0xff]  ;;  %v343_v24 = vld [vmem:[#allocation7 + $0x40] sm:$0xff]  ;;  %v342_v25 = vld [vmem:[#allocation7 + $0x38] sm:$0xff] }
  0x39   : > { %300 = vmatpush.msra.mxu0 %v287_v4  ;;  %356 = vmatpush.msra.mxu1 %v349_v18  ;;  %v341_v26 = vld [vmem:[#allocation7 + $0x30] sm:$0xff]  ;;  %v340_v27 = vld [vmem:[#allocation7 + $0x28] sm:$0xff]  ;;  %v339_v28 = vld [vmem:[#allocation7 + $0x20] sm:$0xff]  ;;  %p682_p5 = pneg %p681_p3 }
  0x3a   : > { %v338_v29 = vld [vmem:[#allocation7 + $0x18] sm:$0xff]  ;;  %v337_v30 = vld [vmem:[#allocation7 + $0x10] sm:$0xff]  ;;  %v336_v31 = vld [vmem:[#allocation7 + $0x8] sm:$0xff] }
  0x3b   : > { %301 = vmatpush.msra.mxu0 %v286_v5  ;;  %357 = vmatpush.msra.mxu1 %v348_v19  ;;  %v335_v32 = vld [vmem:[#allocation7] sm:$0xff]  ;;  %v567_v33 = vld [vmem:[%s929_s2] ss:$0 sm:$0xff]  ;;  %p687_p9 = pnand %p686_p8, %p682_p5 }
  0x3c   : > { %v568_v49 = vld [vmem:[%s931_s4] ss:$0 sm:$0xff] }
  0x3d   : > { %302 = vmatpush.msra.mxu0 %v285_v6  ;;  %358 = vmatpush.msra.mxu1 %v347_v20 }
  0x3f   : > { %303 = vmatpush.msra.mxu0 %v284_v7  ;;  %359 = vmatpush.msra.mxu1 %v346_v21 }
  0x41   : > { %304 = vmatpush.msra.mxu0 %v283_v8  ;;  %360 = vmatpush.msra.mxu1 %v345_v22 }
  0x43   : > { %305 = vmatpush.msra.mxu0 %v282_v9  ;;  %361 = vmatpush.msra.mxu1 %v344_v23 }
  0x45   : > { %306 = vmatpush.msra.mxu0 %v281_v10  ;;  %362 = vmatpush.msra.mxu1 %v343_v24 }
  0x47   : > { %307 = vmatpush.msra.mxu0 %v280_v11  ;;  %363 = vmatpush.msra.mxu1 %v342_v25 }
  0x49   : > { %308 = vmatpush.msra.mxu0 %v279_v12  ;;  %364 = vmatpush.msra.mxu1 %v341_v26 }
  0x4b   : > { %309 = vmatpush.msra.mxu0 %v278_v13  ;;  %365 = vmatpush.msra.mxu1 %v340_v27 }
  0x4d   : > { %310 = vmatpush.msra.mxu0 %v277_v14  ;;  %366 = vmatpush.msra.mxu1 %v339_v28 }
  0x4f   : > { %311 = vmatpush.msra.mxu0 %v276_v15  ;;  %367 = vmatpush.msra.mxu1 %v338_v29 }
  0x50   : > { %312 = vmatmul.f32.vlgmr.msra.gmra.mxu0 %v275_v16 }
  0x51   : > { %368 = vmatpush.msra.mxu1 %v337_v30 }
  0x53   : > { %369 = vmatpush.msra.mxu1 %v336_v31 }
  0x55   : > { %370 = vmatpush.msra.mxu1 %v335_v32 }
  0xcd   : > { %v313_v34 = vpop.f32.mrf.mxu0 }
  0xce   : > { %v314_v35 = vadd.f32 %v567_v33, %v313_v34 }
  0xd0   : > { %v493_v36 = vmul.f32 -1.442695, %v314_v35 }
  0xd2   : > { %569 = vpow2.f32 %v493_v36 }
  0xd8   : > { %v570_v37 = vpop.eup %569 }
  0xd9   : > { %v319_v38 = vadd.f32 1.0, %v570_v37 }
  0xdb   : > { %571 = vrcp.f32 %v319_v38  ;;  %v331_v42 = vand.u32 2147483648, %v319_v38  ;;  %v329_v44 = vand.u32 2147483647, %v319_v38  ;;  %vm325_vm1 = vweird.f32 %v319_v38 }
  0xdd   : > { %v332_v46 = vor.u32 1.1754944e-38, %v331_v42  ;;  %vm330_vm3 = vcmp.eq.f32.partialorder %v329_v44, 8.507059e+37 }
  0xe1   : > { %v572_v39 = vpop.eup %571 }
  0xe2   : > { %v321_v40 = vmul.f32 %v572_v39, %v319_v38  ;;  %vm326_vm0 = vweird.f32 %v572_v39 }
  0xe3   : > { %vm327_vm2 = vmor %vm325_vm1, %vm326_vm0 }
  0xe4   : > { %v322_v41 = vsub.f32 1.0, %v321_v40 }
  0xe6   : > { %v323_v43 = vmul.f32 %v572_v39, %v322_v41 }
  0xe8   : > { %v324_v45 = vadd.f32 %v572_v39, %v323_v43 }
  0xea   : > { %v328_v47 = vsel %vm327_vm2, %v572_v39, %v324_v45 }
  0xeb   : > { %v333_v48 = vsel %vm330_vm3, %v332_v46, %v328_v47 }
  0xec   : > { %371 = vmatmul.f32.vlgmr.msra.gmra.mxu1 %v333_v48 }
 0x169   : > { %v372_v50 = vpop.f32.mrf.mxu1 }
 0x16a   : > { %v373_v51 = vadd.f32 %v568_v49, %v372_v50 }
 0x16c   : > { %375 = vst [vmem:[%s274_s28] sm:$0xff] %v373_v51 }
 0x16d   : > { %690 = shalt.err (!%p687_p9)
}
 0x16e   : > { %508 = dma.vmem_to_hbm [thread:$0]  (%p838_p4), %s390_s29, 128, %s392_s30, %s377_s16  }
 0x16f PF: > { %s403_s22 = sand.u32 1, %s721_s18   ;;  %p939_p10 = scmp.ge.s32.totalorder %s733_s21, 2 }
 0x170   : > { %s404_s9 = scalar_lea.sflag [#allocation4], %s403_s22 }
 0x171   : > { %p522_p13 = pnand %p939_p10, %p842_p6 }
 0x173   : > { %p523_p11 = pneg %p522_p13 }
 0x175   : > { %716 = dma.done.wait (%p523_p11), %s404_s9, 128  }
 0x176   : > { %718 = vsyncadd (%p523_p11), %s404_s9, 4294967168  ;;  %p19_p0 = scmp.ge.s32.totalorder %s812_s12, 4   ;;  %s940_s18 = smov %s725_s19 }
 0x177   : > { %s941_s19 = smov %s729_s20  ;;  %s942_s20 = smov %s823_s15 }
 0x178   : > { %s943_s21 = smov %s812_s12  ;;  %21 = sbr.rel (!%p19_p0) target bundleno = 6 (0x6), region = 93 }
 0x17d   :  { %410 = vsyncpa [#allocation3], 1 }
 0x17e   :  { %412 = vsyncpa [#allocation3 + $0x1], 1 }
 0x17f   :  { %413 = vsyncpa [#allocation6], 1 }
 0x180   :  { %414 = vsyncpa [#allocation4], 1 }
 0x181   :  { %416 = vsyncpa [#allocation4 + $0x1], 1 }

</bundles_post_ra>
